<compile_context>
chip_gen: v6e
topology: v6e:2x2x1
jax: 0.10.0
libtpu: 0.0.40
codegen_flags: <defaults>
</compile_context>

<pallas_src>
import functools

import jax
import jax.numpy as jnp
from jax.experimental import pallas as pl
from jax.experimental.pallas import tpu as pltpu

ACTIVATION = "tanh"  # one of: 'tanh', 'sin', 'relu', 'sigmoid(tanh)'


def _apply_activation(y, name):
    if name == "tanh":
        return jnp.tanh(y)
    elif name == "sin":
        return jnp.sin(y)
    elif name == "relu":
        return jnp.maximum(y, 0.0)
    elif name == "sigmoid(tanh)":
        return jax.nn.sigmoid(jnp.tanh(y))
    else:
        raise ValueError(f"Unsupported activation function: {name}")


def _round_up(v, m):
    return ((v + m - 1) // m) * m


def _largest_divisor_tile(dim_pad, unit, cap):
    """Largest tile t = unit * d with t <= cap and t dividing dim_pad.

    dim_pad is already a multiple of `unit`, so a valid answer always exists.
    """
    q = dim_pad // unit
    max_d = max(1, min(q, cap // unit))
    for d in range(max_d, 0, -1):
        if q % d == 0:
            return unit * d
    return unit


# ---------------------------------------------------------------------------
# Kernels
# ---------------------------------------------------------------------------
def _kernel_acc_in_out(x_ref, wt_ref, b_ref, o_ref, *, activation):
    # f32 output: accumulate directly in the output block (resident across K).
    # x_ref : [tm, tk], wt_ref: [tk, tn] (MXU-native [K, N]), b_ref: [1, tn] f32
    # o_ref : [tm, tn] f32
    k = pl.program_id(2)

    @pl.when(k == 0)
    def _():
        o_ref[...] = jnp.broadcast_to(b_ref[...], o_ref.shape)

    o_ref[...] += jnp.dot(
        x_ref[...], wt_ref[...], preferred_element_type=jnp.float32
    )

    @pl.when(k == pl.num_programs(2) - 1)
    def _():
        o_ref[...] = _apply_activation(o_ref[...], activation)


def _kernel_acc_in_scratch(x_ref, wt_ref, b_ref, o_ref, acc_ref, *, activation):
    # Non-f32 output: f32 VMEM accumulator, cast in the epilogue.
    k = pl.program_id(2)

    @pl.when(k == 0)
    def _():
        acc_ref[...] = jnp.broadcast_to(b_ref[...], acc_ref.shape)

    acc_ref[...] += jnp.dot(
        x_ref[...], wt_ref[...], preferred_element_type=jnp.float32
    )

    @pl.when(k == pl.num_programs(2) - 1)
    def _():
        o_ref[...] = _apply_activation(acc_ref[...], activation).astype(o_ref.dtype)


# ---------------------------------------------------------------------------
# One-time parameter preparation (hoisted out of the forward path)
# ---------------------------------------------------------------------------
def prepare_hidden_layer_params(weight, bias, *, matmul_dtype=None):
    """Transpose W to MXU-native [K, N], pad K/N to lane multiples, and store
    the bias as an f32 [1, N_pad] row.  Call once at parameter-setup time and
    reuse the result across forward calls."""
    out_features, in_features = weight.shape
    assert bias.shape == (out_features,)

    k_pad = _round_up(in_features, 128)
    n_pad = _round_up(out_features, 128)

    w_t = weight.T  # [in_features, out_features]
    if (k_pad, n_pad) != (in_features, out_features):
        w_t = jnp.pad(w_t, ((0, k_pad - in_features), (0, n_pad - out_features)))
    if matmul_dtype is not None:
        w_t = w_t.astype(matmul_dtype)

    b_p = bias.reshape(1, out_features).astype(jnp.float32)
    if n_pad != out_features:
        b_p = jnp.pad(b_p, ((0, 0), (0, n_pad - out_features)))

    return {
        "w_t": w_t,            # [K_pad, N_pad], optionally bf16
        "b": b_p,              # [1, N_pad] f32
        "in_features": in_features,
        "out_features": out_features,
    }


# ---------------------------------------------------------------------------
# Forward
# ---------------------------------------------------------------------------
def hidden_layer_apply(
    x, params, *, activation=ACTIVATION, tm_cap=512, tn_cap=512, tk_cap=512
):
    """Apply one (Linear -> activation) layer using pre-prepared params.

    x: [batch, in_features]; params from prepare_hidden_layer_params().
    Tile caps default to a footprint that fits every generation's default
    scoped VMEM; bump them (e.g. 1024) on v6e/v5e if the layer is mem-bound.
    """
    batch, in_features = x.shape
    assert in_features == params["in_features"]
    out_features = params["out_features"]

    w_t = params["w_t"]
    b_p = params["b"]
    k_pad, n_pad = w_t.shape
    matmul_dtype = w_t.dtype

    # Sublane rounding: 16 for 16-bit matmul inputs, else 8.
    m_unit = 16 if jnp.dtype(matmul_dtype).itemsize == 2 else 8
    m_pad = _round_up(batch, m_unit)

    x_p = x
    if x_p.dtype != matmul_dtype:
        x_p = x_p.astype(matmul_dtype)
    if (m_pad, k_pad) != (batch, in_features):
        x_p = jnp.pad(x_p, ((0, m_pad - batch), (0, k_pad - in_features)))

    # Tile sizes: largest divisors of the (hardware-minimum-padded) dims.
    tm = _largest_divisor_tile(m_pad, m_unit, tm_cap)
    tn = _largest_divisor_tile(n_pad, 128, tn_cap)
    tk = _largest_divisor_tile(k_pad, 128, tk_cap)

    # Megacore (v7x): ensure >= 2 parallel (i, j) tiles when possible.
    if (m_pad // tm) * (n_pad // tn) < 2:
        if tn % 256 == 0:
            tn //= 2
        elif tm % (2 * m_unit) == 0:
            tm //= 2

    out_dtype = x.dtype
    acc_in_out = out_dtype == jnp.float32

    kernel_fn = _kernel_acc_in_out if acc_in_out else _kernel_acc_in_scratch
    kernel = functools.partial(kernel_fn, activation=activation)
    scratch = [] if acc_in_out else [pltpu.VMEM((tm, tn), jnp.float32)]

    # Double-buffered VMEM footprint estimate; raise the scoped limit only if
    # needed (cap at 48 MiB to stay inside v7x's 64 MiB physical VMEM).
    in_elem = jnp.dtype(matmul_dtype).itemsize
    out_elem = jnp.dtype(out_dtype).itemsize
    footprint = 2 * (tm * tk * in_elem + tk * tn * in_elem + tn * 4) + 2 * tm * tn * out_elem
    if not acc_in_out:
        footprint += tm * tn * 4
    vmem_limit = None
    if footprint > (12 << 20):
        vmem_limit = min(int(footprint * 3 // 2) + (4 << 20), 48 << 20)

    compiler_params = pltpu.CompilerParams(
        dimension_semantics=("parallel", "parallel", "arbitrary"),
        vmem_limit_bytes=vmem_limit,
    )

    cost = pl.CostEstimate(
        flops=2 * m_pad * n_pad * k_pad,
        transcendentals=m_pad * n_pad,
        bytes_accessed=(
            m_pad * k_pad * in_elem
            + k_pad * n_pad * in_elem
            + n_pad * 4
            + m_pad * n_pad * out_elem
        ),
    )

    out_padded = pl.pallas_call(
        kernel,
        out_shape=jax.ShapeDtypeStruct((m_pad, n_pad), out_dtype),
        grid_spec=pltpu.PrefetchScalarGridSpec(
            num_scalar_prefetch=0,
            grid=(m_pad // tm, n_pad // tn, k_pad // tk),
            in_specs=[
                pl.BlockSpec((tm, tk), lambda i, j, k: (i, k)),   # x
                pl.BlockSpec((tk, tn), lambda i, j, k: (k, j)),   # W.T  [K, N]
                pl.BlockSpec((1, tn), lambda i, j, k: (0, j)),    # bias
            ],
            out_specs=pl.BlockSpec((tm, tn), lambda i, j, k: (i, j)),
            scratch_shapes=scratch,
        ),
        compiler_params=compiler_params,
        cost_estimate=cost,
    )(x_p, w_t, b_p)

    if (m_pad, n_pad) != (batch, out_features):
        out_padded = out_padded[:batch, :out_features]
    return out_padded


def hidden_layers_forward(
    x, weight, bias, *, activation=ACTIVATION, matmul_dtype=None, **tile_kwargs
):
    """Convenience wrapper: prepare params then apply.  For repeated calls,
    hoist prepare_hidden_layer_params() out of the loop."""
    params = prepare_hidden_layer_params(weight, bias, matmul_dtype=matmul_dtype)
    return hidden_layer_apply(x, params, activation=activation, **tile_kwargs)


# ---------------------------------------------------------------------------
# Reference + self-test
# ---------------------------------------------------------------------------
def _reference(x, weight, bias, activation):
    y = x.astype(jnp.float32) @ weight.T.astype(jnp.float32) + bias.astype(jnp.float32)
    return _apply_activation(y, activation).astype(x.dtype)


if __name__ == "__main__":
    key = jax.random.PRNGKey(0)

    # --- Case 1: small shapes consistent with the module (batch=8, in=32, out=32).
    batch, in_features, out_features = 8, 32, 32
    kx, kw, kb, key = jax.random.split(key, 4)
    bound = 1.0 / jnp.sqrt(jnp.float32(in_features))
    x = jax.random.normal(kx, (batch, in_features), dtype=jnp.float32)
    weight = jax.random.uniform(
        kw, (out_features, in_features), dtype=jnp.float32,
        minval=-bound, maxval=bound)
    bias = jax.random.uniform(
        kb, (out_features,), dtype=jnp.float32, minval=-bound, maxval=bound)

    params = prepare_hidden_layer_params(weight, bias)   # one-time prep
    out = jax.block_until_ready(hidden_layer_apply(x, params))
    ref = _reference(x, weight, bias, ACTIVATION)
    assert out.shape == (batch, out_features)
    assert jnp.allclose(out, ref, atol=1e-5, rtol=1e-5)

    # --- Case 2: ragged shapes with multiple M/N/K tiles to exercise the
    # resident-output accumulator / padding / multi-tile path.
    batch, in_features, out_features = 200, 272, 200
    kx, kw, kb, key = jax.random.split(key, 4)
    bound = 1.0 / jnp.sqrt(jnp.float32(in_features))
    x2 = jax.random.normal(kx, (batch, in_features), dtype=jnp.float32)
    w2 = jax.random.uniform(
        kw, (out_features, in_features), dtype=jnp.float32,
        minval=-bound, maxval=bound)
    b2 = jax.random.uniform(
        kb, (out_features,), dtype=jnp.float32, minval=-bound, maxval=bound)

    out2 = jax.block_until_ready(
        hidden_layers_forward(x2, w2, b2, tm_cap=64, tn_cap=128, tk_cap=128))
    ref2 = _reference(x2, w2, b2, ACTIVATION)
    assert out2.shape == (batch, out_features)
    assert jnp.allclose(out2, ref2, atol=1e-5, rtol=1e-5)

    # --- Case 3: bf16 matmul path (f32 accumulation), looser tolerance.
    batch, in_features, out_features = 64, 256, 256
    kx, kw, kb, key = jax.random.split(key, 4)
    bound = 1.0 / jnp.sqrt(jnp.float32(in_features))
    x3 = jax.random.normal(kx, (batch, in_features), dtype=jnp.float32)
    w3 = jax.random.uniform(
        kw, (out_features, in_features), dtype=jnp.float32,
        minval=-bound, maxval=bound)
    b3 = jax.random.uniform(
        kb, (out_features,), dtype=jnp.float32, minval=-bound, maxval=bound)

    out3 = jax.block_until_ready(
        hidden_layers_forward(x3, w3, b3, matmul_dtype=jnp.bfloat16))
    ref3 = _reference(x3, w3, b3, ACTIVATION)
    assert out3.shape == (batch, out_features)
    assert jnp.allclose(out3, ref3, atol=2e-2, rtol=2e-2)

    print("KERNEL_OK")
</pallas_src>

<mosaic_0001>
module attributes {stable_mosaic.version = 11 : i64} {
  func.func @_kernel_acc_in_out(%arg0: i32, %arg1: i32, %arg2: i32, %arg3: memref<8x128xf32, #tpu.memory_space<vmem>>, %arg4: memref<128x128xf32, #tpu.memory_space<vmem>>, %arg5: memref<1x128xf32, #tpu.memory_space<vmem>>, %arg6: memref<8x128xf32, #tpu.memory_space<vmem>>) attributes {dimension_semantics = [#tpu.dimension_semantics<parallel>, #tpu.dimension_semantics<parallel>, #tpu.dimension_semantics<arbitrary>], iteration_bounds = array<i64: 1, 1, 1>, scalar_prefetch = 0 : i64, scratch_operands = 0 : i64, tpu.core_type = #tpu.core_type<tc>, window_params = [{transform_indices = @transform_0, window_bounds = array<i64: 8, 128>}, {transform_indices = @transform_1, window_bounds = array<i64: 128, 128>}, {transform_indices = @transform_2, window_bounds = array<i64: 1, 128>}, {transform_indices = @transform_3, window_bounds = array<i64: 8, 128>}]} {
    %c0_i32 = arith.constant 0 : i32
    %0 = arith.cmpi eq, %arg2, %c0_i32 : i32
    %1 = arith.extui %0 : i1 to i32
    %c0_i32_0 = arith.constant 0 : i32
    %2 = arith.cmpi ne, %1, %c0_i32_0 : i32
    scf.if %2 {
      %c0_10 = arith.constant 0 : index
      %c0_11 = arith.constant 0 : index
      %12 = vector.load %arg5[%c0_10, %c0_11] : memref<1x128xf32, #tpu.memory_space<vmem>>, vector<1x128xf32>
      %13 = vector.shape_cast %12 : vector<1x128xf32> to vector<1x128xf32>
      %14 = vector.broadcast %13 : vector<1x128xf32> to vector<8x128xf32>
      %c0_12 = arith.constant 0 : index
      %c0_13 = arith.constant 0 : index
      %15 = vector.load %arg6[%c0_12, %c0_13] : memref<8x128xf32, #tpu.memory_space<vmem>>, vector<8x128xf32>
      tpu.vector_store %arg6[%c0_12, %c0_13], %14 {strides = array<i32>} : memref<8x128xf32, #tpu.memory_space<vmem>>, vector<8x128xf32>,
    } else {
    }
    %c0 = arith.constant 0 : index
    %c0_1 = arith.constant 0 : index
    %3 = vector.load %arg6[%c0, %c0_1] : memref<8x128xf32, #tpu.memory_space<vmem>>, vector<8x128xf32>
    %c0_2 = arith.constant 0 : index
    %c0_3 = arith.constant 0 : index
    %4 = vector.load %arg3[%c0_2, %c0_3] : memref<8x128xf32, #tpu.memory_space<vmem>>, vector<8x128xf32>
    %c0_4 = arith.constant 0 : index
    %c0_5 = arith.constant 0 : index
    %5 = vector.load %arg4[%c0_4, %c0_5] : memref<128x128xf32, #tpu.memory_space<vmem>>, vector<128x128xf32>
    %cst = arith.constant dense<0.000000e+00> : vector<8x128xf32>
    %6 = tpu.matmul %4, %5, %cst {dimension_numbers = #tpu.dot_dimension_numbers<[1], [0], [0], [1], [0, 0, 1, 1], [], []>} : vector<8x128xf32>, vector<128x128xf32>, vector<8x128xf32> -> vector<8x128xf32>
    %7 = arith.addf %3, %6 : vector<8x128xf32>
    %c0_6 = arith.constant 0 : index
    %c0_7 = arith.constant 0 : index
    %8 = vector.load %arg6[%c0_6, %c0_7] : memref<8x128xf32, #tpu.memory_space<vmem>>, vector<8x128xf32>
    tpu.vector_store %arg6[%c0_6, %c0_7], %7 {strides = array<i32>} : memref<8x128xf32, #tpu.memory_space<vmem>>, vector<8x128xf32>,
    %c0_i32_8 = arith.constant 0 : i32
    %9 = arith.cmpi eq, %arg2, %c0_i32_8 : i32
    %10 = arith.extui %9 : i1 to i32
    %c0_i32_9 = arith.constant 0 : i32
    %11 = arith.cmpi ne, %10, %c0_i32_9 : i32
    scf.if %11 {
      %c0_10 = arith.constant 0 : index
      %c0_11 = arith.constant 0 : index
      %12 = vector.load %arg6[%c0_10, %c0_11] : memref<8x128xf32, #tpu.memory_space<vmem>>, vector<8x128xf32>
      %13 = math.tanh %12 : vector<8x128xf32>
      %c0_12 = arith.constant 0 : index
      %c0_13 = arith.constant 0 : index
      %14 = vector.load %arg6[%c0_12, %c0_13] : memref<8x128xf32, #tpu.memory_space<vmem>>, vector<8x128xf32>
      tpu.vector_store %arg6[%c0_12, %c0_13], %13 {strides = array<i32>} : memref<8x128xf32, #tpu.memory_space<vmem>>, vector<8x128xf32>,
    } else {
    }
    return
  }
  func.func @transform_0(%arg0: i32, %arg1: i32, %arg2: i32) -> (i32, i32) {
    %c0_i32 = arith.constant 0 : i32
    return %arg0, %arg2 : i32, i32
  }
  func.func @transform_1(%arg0: i32, %arg1: i32, %arg2: i32) -> (i32, i32) {
    %c0_i32 = arith.constant 0 : i32
    return %arg2, %arg1 : i32, i32
  }
  func.func @transform_2(%arg0: i32, %arg1: i32, %arg2: i32) -> (i32, i32) {
    %c0_i32 = arith.constant 0 : i32
    %c0_i32_0 = arith.constant 0 : i32
    return %c0_i32, %arg1 : i32, i32
  }
  func.func @transform_3(%arg0: i32, %arg1: i32, %arg2: i32) -> (i32, i32) {
    %c0_i32 = arith.constant 0 : i32
    return %arg0, %arg1 : i32, i32
  }
}

</mosaic_0001>

<bundles_post_ra>
// kernel: tpu_custom_call.1
= control target key start
LH: loop header
LB: loop body
LE: loop exit
PB: predicated region body
PF: predicated region fallthrough
CT: control target
= control target key end

     0   :  { %8 = vsyncpa [#allocation3], 0  ;;  %s332_s0 = inlined_call_operand.hbm [shape: f32[8,128], index: 0, kind: input, shape index: {}]   ;;  %s333_s1 = inlined_call_operand.hbm [shape: f32[128,128], index: 1, kind: input, shape index: {}]   ;;  %s334_s2 = inlined_call_operand.vmem [shape: f32[1,128], index: 2, kind: input, shape index: {}]   ;;  %s335_s3 = inlined_call_operand.hbm [shape: f32[8,128], index: 3, kind: output, shape index: {}]  }
   0x1   :  { %9 = vsyncpa [#allocation6], 0 }
   0x2   :  { %10 = vsyncpa [#allocation4], 0  ;;  %s293_s12 = smov [#allocation2]   ;;  %s294_s14 = smov [#allocation5]  }
   0x3   :  { %s17_s13 = sshll.u32 %s293_s12, 4  ;;  %s26_s15 = sshll.u32 %s294_s14, 4  ;;  %s18_s13 = int_to_ptr.vmem [resolvable:$true] %s17_s13  ;;  %s27_s15 = int_to_ptr.vmem [resolvable:$true] %s26_s15 }
   0x4   :  { %s235_s16 = scalar_lea.vmem %s18_s13, 128  ;;  %p240_p1 = scmp.lt.s32.totalorder %s18_s13, %s18_s13 }
   0x5   :  { %p236_p0 = scmp.ne.s32.totalorder %s18_s13, %s235_s16  ;;  %p241_p2 = scmp.lt.s32.totalorder %s235_s16, %s235_s16 }
   0x7   :  { %p242_p3 = por %p241_p2, %p240_p1 }
   0x9   :  { %p243_p4 = pnand %p242_p3, %p236_p0 }
   0xb   :  { %246 = shalt.err (!%p243_p4)
}
   0xc   :  { %20 = dma.hbm_to_vmem [thread:$0]  %s332_s0, 128, %s18_s13, [#allocation3]  }
   0xd   :  { %s255_s19 = scalar_lea.vmem %s27_s15, 2048  ;;  %p260_p6 = scmp.lt.s32.totalorder %s27_s15, %s27_s15 }
   0xe   :  { %p256_p5 = scmp.ne.s32.totalorder %s27_s15, %s255_s19  ;;  %p261_p7 = scmp.lt.s32.totalorder %s255_s19, %s255_s19 }
  0x10   :  { %p262_p8 = por %p261_p7, %p260_p6 }
  0x12   :  { %p263_p9 = pnand %p262_p8, %p256_p5 }
  0x14   :  { %266 = shalt.err (!%p263_p9)
}
  0x15   :  { %s295_s20 = smov 128   ;;  %s296_s21 = smov 8  }
  0x16   :  { %32 = dma.hbm_to_vmem [thread:$0]  %s333_s1, 2048, %s27_s15, [#allocation6], %s295_s20, %s295_s20, %s296_s21  }
  0x17   :  { %287 = dma.done.wait [#allocation3], 128  }
  0x18   :  { %288 = vsyncadd [#allocation3], 4294967168 }
  0x19   :  { %289 = dma.done.wait [#allocation6], 2048  }
  0x1a   :  { %290 = vsyncadd [#allocation6], 4294965248  ;;  %v297_v0 = vmov 0.0   ;;  %vm298_vm0 = vmmov 0   ;;  %v70_v1 = vld [vmem:[#allocation5 + $0x78] sm:$0xff]  ;;  %v69_v2 = vld [vmem:[#allocation5 + $0x70] sm:$0xff] }
  0x1b   :  { %183 = vmatprep.subr.mxu0 %v297_v0  ;;  %215 = vmatprep.mubr.msk.f32.mxu0 %vm298_vm0, %v297_v0  ;;  %v68_v3 = vld [vmem:[#allocation5 + $0x68] sm:$0xff]  ;;  %v67_v4 = vld [vmem:[#allocation5 + $0x60] sm:$0xff]  ;;  %v66_v5 = vld [vmem:[#allocation5 + $0x58] sm:$0xff]  ;;  %s299_s24 = smov [#allocation7]  }
  0x1c   :  { %184 = vmatpush3.msra.mxu0 %v70_v1  ;;  %v65_v6 = vld [vmem:[#allocation5 + $0x50] sm:$0xff]  ;;  %v64_v7 = vld [vmem:[#allocation5 + $0x48] sm:$0xff]  ;;  %v63_v8 = vld [vmem:[#allocation5 + $0x40] sm:$0xff]  ;;  %s155_s25 = sshll.u32 %s299_s24, 4  ;;  %s156_s25 = int_to_ptr.vmem [resolvable:$true] %s155_s25 }
  0x1d   :  { %185 = vmatprep.subr.mxu0 %v297_v0  ;;  %v62_v9 = vld [vmem:[#allocation5 + $0x38] sm:$0xff]  ;;  %v61_v10 = vld [vmem:[#allocation5 + $0x30] sm:$0xff]  ;;  %v60_v11 = vld [vmem:[#allocation5 + $0x28] sm:$0xff]  ;;  %s267_s26 = scalar_lea.vmem %s156_s25, 128  ;;  %p272_p11 = scmp.lt.s32.totalorder %s156_s25, %s156_s25 }
  0x1e   :  { %186 = vmatpush3.msra.mxu0 %v69_v2  ;;  %v59_v12 = vld [vmem:[#allocation5 + $0x20] sm:$0xff]  ;;  %v58_v13 = vld [vmem:[#allocation5 + $0x18] sm:$0xff]  ;;  %v57_v14 = vld [vmem:[#allocation5 + $0x10] sm:$0xff]  ;;  %p268_p10 = scmp.ne.s32.totalorder %s156_s25, %s267_s26  ;;  %p273_p12 = scmp.lt.s32.totalorder %s267_s26, %s267_s26 }
  0x1f   :  { %187 = vmatprep.subr.mxu0 %v297_v0  ;;  %v56_v15 = vld [vmem:[#allocation5 + $0x8] sm:$0xff]  ;;  %v55_v16 = vld [vmem:[#allocation5] sm:$0xff]  ;;  %v54_v17 = vld [vmem:[#allocation2] sm:$0xff] }
  0x20   :  { %188 = vmatpush3.msra.mxu0 %v68_v3  ;;  %v165_v18 = vld [vmem:[%s334_s2] ss:$0 sm:$0xff]  ;;  %p274_p13 = por %p273_p12, %p272_p11 }
  0x21   :  { %189 = vmatprep.subr.mxu0 %v297_v0 }
  0x22   :  { %190 = vmatpush3.msra.mxu0 %v67_v4  ;;  %p275_p0 = pnand %p274_p13, %p268_p10 }
  0x23   :  { %191 = vmatprep.subr.mxu0 %v297_v0 }
  0x24   :  { %192 = vmatpush3.msra.mxu0 %v66_v5 }
  0x25   :  { %193 = vmatprep.subr.mxu0 %v297_v0 }
  0x26   :  { %194 = vmatpush3.msra.mxu0 %v65_v6 }
  0x27   :  { %195 = vmatprep.subr.mxu0 %v297_v0 }
  0x28   :  { %196 = vmatpush3.msra.mxu0 %v64_v7 }
  0x29   :  { %197 = vmatprep.subr.mxu0 %v297_v0 }
  0x2a   :  { %198 = vmatpush3.msra.mxu0 %v63_v8 }
  0x2b   :  { %199 = vmatprep.subr.mxu0 %v297_v0 }
  0x2c   :  { %200 = vmatpush3.msra.mxu0 %v62_v9 }
  0x2d   :  { %201 = vmatprep.subr.mxu0 %v297_v0 }
  0x2e   :  { %202 = vmatpush3.msra.mxu0 %v61_v10 }
  0x2f   :  { %203 = vmatprep.subr.mxu0 %v297_v0 }
  0x30   :  { %204 = vmatpush3.msra.mxu0 %v60_v11 }
  0x31   :  { %205 = vmatprep.subr.mxu0 %v297_v0 }
  0x32   :  { %206 = vmatpush3.msra.mxu0 %v59_v12 }
  0x33   :  { %207 = vmatprep.subr.mxu0 %v297_v0 }
  0x34   :  { %208 = vmatpush3.msra.mxu0 %v58_v13 }
  0x35   :  { %209 = vmatprep.subr.mxu0 %v297_v0 }
  0x36   :  { %210 = vmatpush3.msra.mxu0 %v57_v14 }
  0x37   :  { %211 = vmatprep.subr.mxu0 %v297_v0 }
  0x38   :  { %212 = vmatpush3.msra.mxu0 %v56_v15 }
  0x39   :  { %213 = vmatprep.subr.mxu0 %v297_v0 }
  0x3a   :  { %214 = vmatpush3.msra.mxu0 %v55_v16 }
  0x3b   :  { %216 = vmatmul.mubr.f32.vlgmr.msra.gmra.mxu0 %v54_v17 }
  0xfb   :  { %v137_v19 = vpop.f32.mrf.mxu0 }
  0xfc   :  { %v141_v20 = vadd.f32 %v165_v18, %v137_v19 }
  0xfd   :  { %v217_v21 = vpop.f32.mrf.mxu0 }
  0xfe   :  { %225 = vtanh.f32 %v141_v20 }
 0x10b   :  { %v226_v22 = vpop.eup %225 }
 0x10c   :  { %148 = vst [vmem:[#allocation7] sm:$0xff] %v226_v22 }
 0x10d   :  { %278 = shalt.err (!%p275_p0)
}
 0x10e   :  { %158 = dma.vmem_to_hbm [thread:$0]  %s156_s25, 128, %s335_s3, [#allocation4]  }
 0x10f   :  { %291 = dma.done.wait [#allocation4], 128  }
 0x110   :  { %292 = vsyncadd [#allocation4], 4294967168 }
 0x111   :  { %162 = vsyncpa [#allocation3], 1 }
 0x112   :  { %163 = vsyncpa [#allocation6], 1 }
 0x113   :  { %164 = vsyncpa [#allocation4], 1 }

</bundles_post_ra>
